<compile_context>
chip_gen: v6e
topology: v6e:2x2x1
jax: 0.10.0
libtpu: 0.0.40
codegen_flags: <defaults>
</compile_context>

<pallas_src>
import functools

import jax
import jax.numpy as jnp
from jax.experimental import pallas as pl
from jax.experimental.pallas import tpu as pltpu

EPS = 1e-6  # timm ViT LayerNorm eps


# ------------------------------ small helpers --------------------------------

def _round_up(x, m):
    return (x + m - 1) // m * m


def _pad_to(a, shape):
    return jnp.pad(a, [(0, t - s) for s, t in zip(a.shape, shape)])


def _bf16(x):
    return x.astype(jnp.bfloat16)


def _layernorm_masked(x, w, b, d_real):
    """LayerNorm over the last dim, ignoring zero-padded lanes >= d_real."""
    dp = x.shape[-1]
    if dp != d_real:
        mask = (jax.lax.broadcasted_iota(jnp.int32, (1, dp), 1) < d_real).astype(x.dtype)
        x = x * mask
        mu = jnp.sum(x, axis=-1, keepdims=True) * (1.0 / d_real)
        c = (x - mu) * mask
    else:
        mu = jnp.mean(x, axis=-1, keepdims=True)
        c = x - mu
    var = jnp.sum(c * c, axis=-1, keepdims=True) * (1.0 / d_real)
    return c * jax.lax.rsqrt(var + EPS) * w + b


def _gelu_exact(x):
    # exact (erf-based) GELU, matching torch.nn.GELU() default
    return 0.5 * x * (1.0 + jax.lax.erf(x * 0.7071067811865476))


# --------------------------------- kernels ------------------------------------

def patch_embed_kernel(p_ref, w_ref, b_ref, o_ref):
    # (tm, K)bf16 @ (K, Dp)bf16 -> f32 accumulate, + (1, Dp)f32 bias
    o_ref[...] = (jnp.dot(p_ref[...], w_ref[...],
                          preferred_element_type=jnp.float32) + b_ref[...])


def fused_vit_kernel(x_ref,
                     ln1w, ln1b, wqkv, bqkv, wproj, bproj,
                     ln2w, ln2b, w1, b1, w2, b2,
                     lnf_w, lnf_b,
                     out_ref, tok_ref,
                     *, num_heads, head_dim, d_real, s_real, s_pad, b_blk):
    l = pl.program_id(1)

    # Layer 0: load this batch group's tokens into the resident VMEM scratch.
    @pl.when(l == 0)
    def _init():
        tok_ref[...] = x_ref[...]

    x = tok_ref[...]                                  # (M, Dp) f32 residual stream
    dp = x.shape[-1]
    scale = float(head_dim) ** -0.5

    # ---- LN1 + fused QKV projection (bf16 MXU, f32 accumulation) ----
    h = _layernorm_masked(x, ln1w[0], ln1b[0], d_real)
    qkv = jnp.dot(_bf16(h), wqkv[0],
                  preferred_element_type=jnp.float32) + bqkv[0]   # (M, 3*Dp)

    # ---- multi-head self-attention: static per-head lane slices, 2D dots ----
    kmask = jax.lax.broadcasted_iota(jnp.int32, (s_pad, s_pad), 1) < s_real
    attn_rows = []
    for bi in range(b_blk):
        r0 = bi * s_pad
        acc = jnp.zeros((s_pad, dp), jnp.float32)
        for hi in range(num_heads):
            c0 = hi * head_dim
            qh = _bf16(qkv[r0:r0 + s_pad, c0:c0 + head_dim])
            kh = _bf16(qkv[r0:r0 + s_pad, dp + c0:dp + c0 + head_dim])
            vh = _bf16(qkv[r0:r0 + s_pad, 2 * dp + c0:2 * dp + c0 + head_dim])
            logits = jax.lax.dot_general(
                qh, kh, (((1,), (1,)), ((), ())),
                preferred_element_type=jnp.float32) * scale       # (s_pad, s_pad)
            logits = jnp.where(kmask, logits, -1e30)              # mask padded keys
            m = jnp.max(logits, axis=-1, keepdims=True)
            p = jnp.exp(logits - m)
            p = p * pl.reciprocal(jnp.sum(p, axis=-1, keepdims=True), approx=True)
            ctx = jnp.dot(_bf16(p), vh, preferred_element_type=jnp.float32)
            # project this head's context straight into the residual width
            acc = acc + jnp.dot(_bf16(ctx), wproj[0, c0:c0 + head_dim, :],
                                preferred_element_type=jnp.float32)
        attn_rows.append(acc)
    attn = attn_rows[0] if b_blk == 1 else jnp.concatenate(attn_rows, axis=0)
    x = x + attn + bproj[0]

    # ---- LN2 + MLP ----
    h2 = _layernorm_masked(x, ln2w[0], ln2b[0], d_real)
    h2 = jnp.dot(_bf16(h2), w1[0], preferred_element_type=jnp.float32) + b1[0]
    h2 = _gelu_exact(h2)
    h2 = jnp.dot(_bf16(h2), w2[0], preferred_element_type=jnp.float32) + b2[0]
    x_new = x + h2
    tok_ref[...] = x_new

    # ---- fused final LayerNorm + cls-token pooling at the last layer ----
    @pl.when(l == pl.num_programs(1) - 1)
    def _finalize():
        for bi in range(b_blk):
            row = x_new[bi * s_pad:bi * s_pad + 1, :]             # cls row
            out_ref[bi] = _layernorm_masked(row, lnf_w[...], lnf_b[...], d_real)


# -------------------------------- wrappers -------------------------------------

def patch_embed(patches, w, b):
    """(M, K)bf16 @ (K, Dp)bf16 + (1, Dp)f32, row-tiled with a parallel grid."""
    m0, k = patches.shape
    d = w.shape[1]
    tm = 128 if m0 >= 128 else _round_up(m0, 8)
    mp = _round_up(m0, tm)
    patches = _pad_to(patches, (mp, k))
    out = pl.pallas_call(
        patch_embed_kernel,
        out_shape=jax.ShapeDtypeStruct((mp, d), jnp.float32),
        grid=(mp // tm,),
        in_specs=[pl.BlockSpec((tm, k), lambda i: (i, 0)),
                  pl.BlockSpec((k, d), lambda i: (0, 0)),
                  pl.BlockSpec((1, d), lambda i: (0, 0))],
        out_specs=pl.BlockSpec((tm, d), lambda i: (i, 0)),
        compiler_params=pltpu.CompilerParams(dimension_semantics=("parallel",)),
    )(patches, w, b)
    return out[:m0]


_BLOCK_PARAM_NAMES = ('ln1_w', 'ln1_b', 'wqkv', 'bqkv', 'wproj', 'bproj',
                      'ln2_w', 'ln2_b', 'w1', 'b1', 'w2', 'b2')


def run_fused_blocks(tokens_flat, layer_weights, lnf_w, lnf_b, *,
                     batch, s_pad, d_pad, depth, num_heads, head_dim,
                     d_real, s_real, b_blk=1):
    assert batch % b_blk == 0
    nb = batch // b_blk
    m = b_blk * s_pad
    kernel = functools.partial(
        fused_vit_kernel, num_heads=num_heads, head_dim=head_dim,
        d_real=d_real, s_real=s_real, s_pad=s_pad, b_blk=b_blk)

    def weight_spec(a):
        # per-layer block; index follows the depth grid axis -> next-layer prefetch
        return pl.BlockSpec((1,) + a.shape[1:], lambda b, l: (l, 0, 0))

    in_specs = ([pl.BlockSpec((m, d_pad), lambda b, l: (b, 0))]
                + [weight_spec(a) for a in layer_weights]
                + [pl.BlockSpec((1, d_pad), lambda b, l: (0, 0)),
                   pl.BlockSpec((1, d_pad), lambda b, l: (0, 0))])

    return pl.pallas_call(
        kernel,
        out_shape=jax.ShapeDtypeStruct((batch, 1, d_pad), jnp.float32),
        grid=(nb, depth),                         # batch parallel, depth carried
        in_specs=in_specs,
        out_specs=pl.BlockSpec((b_blk, 1, d_pad), lambda b, l: (b, 0, 0)),
        scratch_shapes=[pltpu.VMEM((m, d_pad), jnp.float32)],  # resident tokens
        compiler_params=pltpu.CompilerParams(
            dimension_semantics=("parallel", "arbitrary"),
            vmem_limit_bytes=64 * 1024 * 1024),
    )(tokens_flat, *layer_weights, lnf_w, lnf_b)


# --------------------------- parameter construction ----------------------------

def init_params(key, *, C, P, D, depth, mlp_dim, n_tokens):
    keys = jax.random.split(key, 4 + depth)
    n = lambda k, shape, s=0.02: (s * jax.random.normal(k, shape)).astype(jnp.float32)
    params = {
        'patch_w': n(keys[0], (C * P * P, D)),
        'patch_b': n(keys[1], (1, D)),
        'cls': n(keys[2], (1, 1, D)),
        'pos': n(keys[3], (1, n_tokens, D)),
        'final_ln_w': jnp.ones((1, D), jnp.float32),
        'final_ln_b': jnp.zeros((1, D), jnp.float32),
        'blocks': [],
    }
    for l in range(depth):
        bk = jax.random.split(keys[4 + l], 4)
        params['blocks'].append({
            'ln1_w': jnp.ones((1, D), jnp.float32),
            'ln1_b': jnp.zeros((1, D), jnp.float32),
            'wqkv': n(bk[0], (D, 3 * D)),
            'bqkv': jnp.zeros((1, 3 * D), jnp.float32),
            'wproj': n(bk[1], (D, D)),
            'bproj': jnp.zeros((1, D), jnp.float32),
            'ln2_w': jnp.ones((1, D), jnp.float32),
            'ln2_b': jnp.zeros((1, D), jnp.float32),
            'w1': n(bk[2], (D, mlp_dim)),
            'b1': jnp.zeros((1, mlp_dim), jnp.float32),
            'w2': n(bk[3], (mlp_dim, D)),
            'b2': jnp.zeros((1, D), jnp.float32),
        })
    return params


def extract_patches(x, P):
    # x: (B, C, H, W) NCHW -> (B, N, C*P*P), row-major patch grid, (c,ph,pw) inner
    B, C, H, W = x.shape
    Hp, Wp = H // P, W // P
    x = x.reshape(B, C, Hp, P, Wp, P)
    x = jnp.transpose(x, (0, 2, 4, 1, 3, 5))        # (B, Hp, Wp, C, P, P)
    return x.reshape(B, Hp * Wp, C * P * P)


def _pad_qkv_weight(w, d, d_pad):
    chunks = [jnp.pad(w[:, i * d:(i + 1) * d], ((0, d_pad - d), (0, d_pad - d)))
              for i in range(3)]
    return jnp.concatenate(chunks, axis=1)           # (d_pad, 3*d_pad)


def _pad_qkv_bias(b, d, d_pad):
    chunks = [jnp.pad(b[:, i * d:(i + 1) * d], ((0, 0), (0, d_pad - d)))
              for i in range(3)]
    return jnp.concatenate(chunks, axis=1)           # (1, 3*d_pad)


def _stack_layer_params(blocks, d, d_pad, f_pad):
    pad_fns = {
        'ln1_w': (lambda a: _pad_to(a, (1, d_pad)), jnp.float32),
        'ln1_b': (lambda a: _pad_to(a, (1, d_pad)), jnp.float32),
        'wqkv': (lambda a: _pad_qkv_weight(a, d, d_pad), jnp.bfloat16),
        'bqkv': (lambda a: _pad_qkv_bias(a, d, d_pad), jnp.float32),
        'wproj': (lambda a: _pad_to(a, (d_pad, d_pad)), jnp.bfloat16),
        'bproj': (lambda a: _pad_to(a, (1, d_pad)), jnp.float32),
        'ln2_w': (lambda a: _pad_to(a, (1, d_pad)), jnp.float32),
        'ln2_b': (lambda a: _pad_to(a, (1, d_pad)), jnp.float32),
        'w1': (lambda a: _pad_to(a, (d_pad, f_pad)), jnp.bfloat16),
        'b1': (lambda a: _pad_to(a, (1, f_pad)), jnp.float32),
        'w2': (lambda a: _pad_to(a, (f_pad, d_pad)), jnp.bfloat16),
        'b2': (lambda a: _pad_to(a, (1, d_pad)), jnp.float32),
    }
    stacked = []
    for name in _BLOCK_PARAM_NAMES:
        fn, dt = pad_fns[name]
        stacked.append(jnp.stack([fn(blk[name]) for blk in blocks]).astype(dt))
    return stacked


# ------------------------------- forward pass -----------------------------------

def vit_encoder_forward(x, params, *, P, num_heads):
    d = params['patch_w'].shape[1]
    depth = len(params['blocks'])
    f = params['blocks'][0]['w1'].shape[1]
    d_pad = _round_up(d, 128)                        # lane-dense embed dim
    f_pad = _round_up(f, 128)
    head_dim = d // num_heads

    patches = extract_patches(x, P)                  # (B, N, C*P*P)
    batch, n, k = patches.shape
    s_real = n + 1
    s_pad = _round_up(s_real, 8)                     # sublane-dense token count

    # --- patch embedding (bf16 operands, f32 accumulation) ---
    pw = _bf16(_pad_to(params['patch_w'], (k, d_pad)))
    pb = _pad_to(params['patch_b'], (1, d_pad))
    emb = patch_embed(_bf16(patches.reshape(batch * n, k)), pw, pb)
    emb = emb.reshape(batch, n, d_pad)

    # --- [cls] + patch tokens + pos_embed, zero-padded to (Sp, Dp) ---
    cls = _pad_to(params['cls'], (1, 1, d_pad))
    pos = _pad_to(params['pos'], (1, s_real, d_pad))
    tokens = jnp.concatenate(
        [jnp.broadcast_to(cls, (batch, 1, d_pad)), emb], axis=1) + pos
    tokens = jnp.pad(tokens, ((0, 0), (0, s_pad - s_real), (0, 0)))
    tokens = tokens.reshape(batch * s_pad, d_pad)

    layer_weights = _stack_layer_params(params['blocks'], d, d_pad, f_pad)
    lnf_w = _pad_to(params['final_ln_w'], (1, d_pad))
    lnf_b = _pad_to(params['final_ln_b'], (1, d_pad))

    pooled = run_fused_blocks(
        tokens, layer_weights, lnf_w, lnf_b,
        batch=batch, s_pad=s_pad, d_pad=d_pad, depth=depth,
        num_heads=num_heads, head_dim=head_dim, d_real=d, s_real=s_real,
        b_blk=1)                                     # 1 batch/step -> v7x megacore
    return pooled[:, 0, :d]                          # 'token' pooling, head=Identity


# --------------------------- pure-JAX f32 reference ------------------------------

def _ref_forward(x, params, *, P, num_heads):
    B = x.shape[0]
    D = params['patch_w'].shape[1]
    patches = extract_patches(x, P)
    emb = patches @ params['patch_w'] + params['patch_b']
    tokens = jnp.concatenate(
        [jnp.broadcast_to(params['cls'], (B, 1, D)), emb], axis=1) + params['pos']

    def ln(t, w, b):
        mu = jnp.mean(t, -1, keepdims=True)
        var = jnp.mean((t - mu) ** 2, -1, keepdims=True)
        return (t - mu) * jax.lax.rsqrt(var + EPS) * w + b

    for blk in params['blocks']:
        S = tokens.shape[1]
        hd = D // num_heads
        h = ln(tokens, blk['ln1_w'], blk['ln1_b'])
        qkv = h @ blk['wqkv'] + blk['bqkv']
        q, k, v = [qkv[..., i * D:(i + 1) * D].reshape(B, S, num_heads, hd)
                   for i in range(3)]
        logits = jnp.einsum('bshd,bthd->bhst', q, k) * hd ** -0.5
        p = jax.nn.softmax(logits, axis=-1)
        ctx = jnp.einsum('bhst,bthd->bshd', p, v).reshape(B, S, D)
        tokens = tokens + ctx @ blk['wproj'] + blk['bproj']
        h2 = ln(tokens, blk['ln2_w'], blk['ln2_b'])
        h2 = h2 @ blk['w1'] + blk['b1']
        h2 = 0.5 * h2 * (1.0 + jax.lax.erf(h2 * 0.7071067811865476))
        tokens = tokens + h2 @ blk['w2'] + blk['b2']
    tokens = ln(tokens, params['final_ln_w'], params['final_ln_b'])
    return tokens[:, 0, :]


# ------------------------------------ main ---------------------------------------

if __name__ == "__main__":
    # Scaled-down vit_base_patch16_224 (pretrained weights -> deterministic init).
    B, C, H, W = 2, 3, 32, 32
    P = 16                      # patch size
    D = 64                      # embed dim (padded to 128 lanes inside the kernel)
    DEPTH = 2
    HEADS = 4
    MLP = 4 * D
    N_TOKENS = (H // P) * (W // P) + 1   # 4 patches + cls = 5 (padded to 8 rows)

    key = jax.random.PRNGKey(0)
    kx, kp = jax.random.split(key)
    x = jax.random.normal(kx, (B, C, H, W), dtype=jnp.float32)
    params = init_params(kp, C=C, P=P, D=D, depth=DEPTH,
                         mlp_dim=MLP, n_tokens=N_TOKENS)

    out = vit_encoder_forward(x, params, P=P, num_heads=HEADS)
    out = jax.block_until_ready(out)
    assert out.shape == (B, D) and out.dtype == jnp.float32

    ref = jax.block_until_ready(_ref_forward(x, params, P=P, num_heads=HEADS))
    assert jnp.allclose(out, ref, rtol=2e-2, atol=2e-2), "mismatch vs JAX reference"

    print("KERNEL_OK")
</pallas_src>

<mosaic_0001>
module attributes {stable_mosaic.version = 11 : i64} {
  func.func @patch_embed_kernel(%arg0: i32, %arg1: memref<8x768xbf16, #tpu.memory_space<vmem>>, %arg2: memref<768x128xbf16, #tpu.memory_space<vmem>>, %arg3: memref<1x128xf32, #tpu.memory_space<vmem>>, %arg4: memref<8x128xf32, #tpu.memory_space<vmem>>) attributes {dimension_semantics = [#tpu.dimension_semantics<parallel>], iteration_bounds = array<i64: 1>, scalar_prefetch = 0 : i64, scratch_operands = 0 : i64, tpu.core_type = #tpu.core_type<tc>, window_params = [{transform_indices = @transform_0, window_bounds = array<i64: 8, 768>}, {pipeline_mode = #tpu.pipeline_mode<synchronous>, transform_indices = @transform_1, window_bounds = array<i64: 768, 128>}, {pipeline_mode = #tpu.pipeline_mode<synchronous>, transform_indices = @transform_2, window_bounds = array<i64: 1, 128>}, {transform_indices = @transform_3, window_bounds = array<i64: 8, 128>}]} {
    %c0 = arith.constant 0 : index
    %c0_0 = arith.constant 0 : index
    %0 = vector.load %arg1[%c0, %c0_0] : memref<8x768xbf16, #tpu.memory_space<vmem>>, vector<8x768xbf16>
    %c0_1 = arith.constant 0 : index
    %c0_2 = arith.constant 0 : index
    %1 = vector.load %arg2[%c0_1, %c0_2] : memref<768x128xbf16, #tpu.memory_space<vmem>>, vector<768x128xbf16>
    %cst = arith.constant dense<0.000000e+00> : vector<8x128xf32>
    %2 = tpu.matmul %0, %1, %cst {dimension_numbers = #tpu.dot_dimension_numbers<[1], [0], [0], [1], [0, 0, 1, 1], [], []>} : vector<8x768xbf16>, vector<768x128xbf16>, vector<8x128xf32> -> vector<8x128xf32>
    %c0_3 = arith.constant 0 : index
    %c0_4 = arith.constant 0 : index
    %3 = vector.load %arg3[%c0_3, %c0_4] : memref<1x128xf32, #tpu.memory_space<vmem>>, vector<1x128xf32>
    %4 = vector.broadcast %3 : vector<1x128xf32> to vector<8x128xf32>
    %5 = arith.addf %2, %4 : vector<8x128xf32>
    %c0_5 = arith.constant 0 : index
    %c0_6 = arith.constant 0 : index
    %6 = vector.load %arg4[%c0_5, %c0_6] : memref<8x128xf32, #tpu.memory_space<vmem>>, vector<8x128xf32>
    tpu.vector_store %arg4[%c0_5, %c0_6], %5 {strides = array<i32>} : memref<8x128xf32, #tpu.memory_space<vmem>>, vector<8x128xf32>,
    return
  }
  func.func @transform_0(%arg0: i32) -> (i32, i32) {
    %c0_i32 = arith.constant 0 : i32
    %c0_i32_0 = arith.constant 0 : i32
    return %arg0, %c0_i32 : i32, i32
  }
  func.func @transform_1(%arg0: i32) -> (i32, i32) {
    %c0_i32 = arith.constant 0 : i32
    %c0_i32_0 = arith.constant 0 : i32
    %c0_i32_1 = arith.constant 0 : i32
    return %c0_i32, %c0_i32_0 : i32, i32
  }
  func.func @transform_2(%arg0: i32) -> (i32, i32) {
    %c0_i32 = arith.constant 0 : i32
    %c0_i32_0 = arith.constant 0 : i32
    %c0_i32_1 = arith.constant 0 : i32
    return %c0_i32, %c0_i32_0 : i32, i32
  }
  func.func @transform_3(%arg0: i32) -> (i32, i32) {
    %c0_i32 = arith.constant 0 : i32
    %c0_i32_0 = arith.constant 0 : i32
    return %arg0, %c0_i32 : i32, i32
  }
}

</mosaic_0001>

<bundles_post_ra>
// kernel: tpu_custom_call.1
= control target key start
LH: loop header
LB: loop body
LE: loop exit
PB: predicated region body
PF: predicated region fallthrough
CT: control target
= control target key end

     0   :  { %8 = vsyncpa [#allocation3], 0  ;;  %s877_s0 = inlined_call_operand.hbm [shape: bf16[8,768], index: 0, kind: input, shape index: {}]   ;;  %s878_s1 = inlined_call_operand.hbm [shape: bf16[768,128], index: 1, kind: input, shape index: {}]   ;;  %s879_s2 = inlined_call_operand.vmem [shape: f32[1,128], index: 2, kind: input, shape index: {}]   ;;  %s880_s3 = inlined_call_operand.hbm [shape: f32[8,128], index: 3, kind: output, shape index: {}]  }
   0x1   :  { %9 = vsyncpa [#allocation6], 0 }
   0x2   :  { %10 = vsyncpa [#allocation4], 0  ;;  %s840_s12 = smov [#allocation2]   ;;  %s841_s14 = smov [#allocation5]  }
   0x3   :  { %s17_s13 = sshll.u32 %s840_s12, 4  ;;  %s26_s15 = sshll.u32 %s841_s14, 4  ;;  %s18_s13 = int_to_ptr.vmem [resolvable:$true] %s17_s13  ;;  %s27_s15 = int_to_ptr.vmem [resolvable:$true] %s26_s15 }
   0x4   :  { %s782_s16 = scalar_lea.vmem %s18_s13, 384  ;;  %p787_p1 = scmp.lt.s32.totalorder %s18_s13, %s18_s13 }
   0x5   :  { %p783_p0 = scmp.ne.s32.totalorder %s18_s13, %s782_s16  ;;  %p788_p2 = scmp.lt.s32.totalorder %s782_s16, %s782_s16 }
   0x7   :  { %p789_p3 = por %p788_p2, %p787_p1 }
   0x9   :  { %p790_p4 = pnand %p789_p3, %p783_p0 }
   0xb   :  { %793 = shalt.err (!%p790_p4)
}
   0xc   :  { %20 = dma.hbm_to_vmem [thread:$0]  %s877_s0, 384, %s18_s13, [#allocation3]  }
   0xd   :  { %s802_s19 = scalar_lea.vmem %s27_s15, 6144  ;;  %p807_p6 = scmp.lt.s32.totalorder %s27_s15, %s27_s15 }
   0xe   :  { %p803_p5 = scmp.ne.s32.totalorder %s27_s15, %s802_s19  ;;  %p808_p7 = scmp.lt.s32.totalorder %s802_s19, %s802_s19 }
  0x10   :  { %p809_p8 = por %p808_p7, %p807_p6 }
  0x12   :  { %p810_p9 = pnand %p809_p8, %p803_p5 }
  0x14   :  { %813 = shalt.err (!%p810_p9)
}
  0x15   :  { %s842_s20 = smov 64   ;;  %s843_s21 = smov 4  }
  0x16   :  { %32 = dma.hbm_to_vmem [thread:$0]  %s878_s1, 6144, %s27_s15, [#allocation6], %s842_s20, %s842_s20, %s843_s21  }
  0x17   :  { %834 = dma.done.wait [#allocation3], 384  }
  0x18   :  { %835 = vsyncadd [#allocation3], 4294966912 }
  0x19   :  { %836 = dma.done.wait [#allocation6], 6144  }
  0x1a   :  { %837 = vsyncadd [#allocation6], 4294961152  ;;  %v720_v0 = vld [vmem:[#allocation5 + $0x78] sm:$0xff]   ;;  %v724_v4 = vld [vmem:[#allocation5 + $0x70] sm:$0xff]   ;;  %s844_s24 = smov [#allocation7]  }
  0x1b   :  { %v721_v1 = vld [vmem:[#allocation5 + $0x38] sm:$0xff]   ;;  %649 = vmatprep.subr.bf16.mxu0 %v720_v0  ;;  %v725_v5 = vld [vmem:[#allocation5 + $0x30] sm:$0xff]   ;;  %v728_v8 = vld [vmem:[#allocation5 + $0x68] sm:$0xff]   ;;  %s584_s25 = sshll.u32 %s844_s24, 4  ;;  %s585_s25 = int_to_ptr.vmem [resolvable:$true] %s584_s25 }
  0x1c   :  { %v722_v2 = vld [vmem:[#allocation5 + $0xf8] sm:$0xff]   ;;  %650 = vmatpush3.bf16.msra.mxu0 %v721_v1  ;;  %v726_v6 = vld [vmem:[#allocation5 + $0xf0] sm:$0xff]   ;;  %v729_v9 = vld [vmem:[#allocation5 + $0x28] sm:$0xff]   ;;  %s814_s26 = scalar_lea.vmem %s585_s25, 128  ;;  %p819_p11 = scmp.lt.s32.totalorder %s585_s25, %s585_s25 }
  0x1d   :  { %v723_v3 = vld [vmem:[#allocation5 + $0xb8] sm:$0xff]   ;;  %671 = vmatprep.subr.bf16.mxu1 %v722_v2  ;;  %651 = vmatprep.subr.bf16.mxu0 %v724_v4  ;;  %v727_v7 = vld [vmem:[#allocation5 + $0xb0] sm:$0xff]   ;;  %v730_v10 = vld [vmem:[#allocation5 + $0xe8] sm:$0xff]   ;;  %p815_p10 = scmp.ne.s32.totalorder %s585_s25, %s814_s26  ;;  %p820_p12 = scmp.lt.s32.totalorder %s814_s26, %s814_s26 }
  0x1e   :  { %672 = vmatpush3.bf16.msra.mxu1 %v723_v3  ;;  %v731_v11 = vld [vmem:[#allocation5 + $0xa8] sm:$0xff]   ;;  %v732_v12 = vld [vmem:[#allocation5 + $0x60] sm:$0xff]   ;;  %v736_v16 = vld [vmem:[#allocation5 + $0x58] sm:$0xff]  }
  0x1f   :  { %673 = vmatprep.subr.bf16.mxu1 %v726_v6  ;;  %v733_v13 = vld [vmem:[#allocation5 + $0x20] sm:$0xff]   ;;  %v737_v17 = vld [vmem:[#allocation5 + $0x18] sm:$0xff]   ;;  %v740_v20 = vld [vmem:[#allocation5 + $0x50] sm:$0xff]   ;;  %p821_p13 = por %p820_p12, %p819_p11 }
  0x20   :  { %652 = vmatpush3.bf16.msra.mxu0 %v725_v5  ;;  %v734_v14 = vld [vmem:[#allocation5 + $0xe0] sm:$0xff]   ;;  %v738_v18 = vld [vmem:[#allocation5 + $0xd8] sm:$0xff]   ;;  %v741_v21 = vld [vmem:[#allocation5 + $0x10] sm:$0xff]  }
  0x21   :  { %653 = vmatprep.subr.bf16.mxu0 %v728_v8  ;;  %v735_v15 = vld [vmem:[#allocation5 + $0xa0] sm:$0xff]   ;;  %v739_v19 = vld [vmem:[#allocation5 + $0x98] sm:$0xff]   ;;  %v742_v22 = vld [vmem:[#allocation5 + $0xd0] sm:$0xff]   ;;  %p822_p0 = pnand %p821_p13, %p815_p10 }
  0x22   :  { %674 = vmatpush3.bf16.msra.mxu1 %v727_v7  ;;  %v743_v23 = vld [vmem:[#allocation5 + $0x90] sm:$0xff]   ;;  %v744_v24 = vld [vmem:[#allocation5 + $0x48] sm:$0xff]   ;;  %v748_v28 = vld [vmem:[#allocation5 + $0x40] sm:$0xff]  }
  0x23   :  { %675 = vmatprep.subr.bf16.mxu1 %v730_v10  ;;  %v745_v25 = vld [vmem:[#allocation5 + $0x8] sm:$0xff]   ;;  %v749_v29 = vld [vmem:[#allocation5] sm:$0xff]   ;;  %v754_v35 = vld [vmem:[#allocation5 + $0x178] sm:$0xff]  }
  0x24   :  { %654 = vmatpush3.bf16.msra.mxu0 %v729_v9  ;;  %v746_v26 = vld [vmem:[#allocation5 + $0xc8] sm:$0xff]   ;;  %v750_v30 = vld [vmem:[#allocation5 + $0xc0] sm:$0xff]   ;;  %v43_v36 = vld [vmem:[#allocation2 + $0x8] sm:$0xff] }
  0x25   :  { %655 = vmatprep.subr.bf16.mxu0 %v732_v12  ;;  %v747_v27 = vld [vmem:[#allocation5 + $0x88] sm:$0xff]   ;;  %v753_v34 = vld [vmem:[#allocation5 + $0x80] sm:$0xff]   ;;  %v597_v37 = vcombine.low %v43_v36, %v43_v36  ;;  %v598_v38 = vcombine.high %v43_v36, %v43_v36  ;;  %v757_v39 = vld [vmem:[#allocation5 + $0x138] sm:$0xff]  }
  0x26   :  { %676 = vmatpush3.bf16.msra.mxu1 %v731_v11  ;;  %v42_v31 = vld [vmem:[#allocation2] sm:$0xff]  ;;  %v758_v40 = vld [vmem:[#allocation5 + $0x170] sm:$0xff]   ;;  %v762_v44 = vld [vmem:[#allocation5 + $0x160] sm:$0xff]  }
  0x27   :  { %677 = vmatprep.subr.bf16.mxu1 %v734_v14  ;;  %v595_v32 = vcombine.low %v42_v31, %v42_v31  ;;  %v596_v33 = vcombine.high %v42_v31, %v42_v31  ;;  %529 = vmatprep.mubr.bf16.mxu1 %v598_v38  ;;  %v759_v41 = vld [vmem:[#allocation5 + $0x130] sm:$0xff]   ;;  %v760_v42 = vld [vmem:[#allocation5 + $0x168] sm:$0xff]   ;;  %v763_v45 = vld [vmem:[#allocation5 + $0x120] sm:$0xff]  }
  0x28   :  { %656 = vmatpush3.bf16.msra.mxu0 %v733_v13  ;;  %v761_v43 = vld [vmem:[#allocation5 + $0x128] sm:$0xff]   ;;  %v764_v46 = vld [vmem:[#allocation5 + $0x158] sm:$0xff]   ;;  %v766_v49 = vld [vmem:[#allocation5 + $0x150] sm:$0xff]  }
  0x29   :  { %657 = vmatprep.subr.bf16.mxu0 %v736_v16  ;;  %489 = vmatprep.mubr.bf16.mxu0 %v596_v33  ;;  %v765_v47 = vld [vmem:[#allocation5 + $0x118] sm:$0xff]   ;;  %v767_v51 = vld [vmem:[#allocation5 + $0x110] sm:$0xff]   ;;  %v768_v52 = vld [vmem:[#allocation5 + $0x148] sm:$0xff]  }
  0x2a   :  { %678 = vmatpush3.bf16.msra.mxu1 %v735_v15  ;;  %v44_v48 = vld [vmem:[#allocation2 + $0x10] sm:$0xff]  ;;  %v769_v53 = vld [vmem:[#allocation5 + $0x108] sm:$0xff]   ;;  %v770_v54 = vld [vmem:[#allocation5 + $0x140] sm:$0xff]  }
  0x2b   :  { %679 = vmatprep.subr.bf16.mxu1 %v738_v18  ;;  %v600_v50 = vcombine.high %v44_v48, %v44_v48  ;;  %v771_v55 = vld [vmem:[#allocation5 + $0x100] sm:$0xff]   ;;  %v599_v56 = vcombine.low %v44_v48, %v44_v48  ;;  %v594_v2 = vld [vmem:[%s879_s2] ss:$0 sm:$0xff] }
  0x2c   :  { %658 = vmatpush3.bf16.msra.mxu0 %v737_v17 }
  0x2d   :  { %659 = vmatprep.subr.bf16.mxu0 %v740_v20 }
  0x2e   :  { %680 = vmatpush3.bf16.msra.mxu1 %v739_v19 }
  0x2f   :  { %681 = vmatprep.subr.bf16.mxu1 %v742_v22 }
  0x30   :  { %660 = vmatpush3.bf16.msra.mxu0 %v741_v21 }
  0x31   :  { %661 = vmatprep.subr.bf16.mxu0 %v744_v24 }
  0x32   :  { %682 = vmatpush3.bf16.msra.mxu1 %v743_v23 }
  0x33   :  { %683 = vmatprep.subr.bf16.mxu1 %v746_v26 }
  0x34   :  { %662 = vmatpush3.bf16.msra.mxu0 %v745_v25 }
  0x35   :  { %663 = vmatprep.subr.bf16.mxu0 %v748_v28 }
  0x36   :  { %684 = vmatpush3.bf16.msra.mxu1 %v747_v27 }
  0x37   :  { %685 = vmatprep.subr.bf16.mxu1 %v750_v30 }
  0x38   :  { %664 = vmatpush3.bf16.msra.mxu0 %v749_v29 }
  0x39   :  { %693 = vmatprep.subr.bf16.mxu0 %v754_v35 }
  0x3a   :  { %686 = vmatpush3.bf16.msra.mxu1 %v753_v34 }
  0x3b   :  { %490 = vmatmul.mubr.bf16.vlgmr.msra.gmra.mxu0 %v595_v32 }
  0x3c   :  { %694 = vmatpush3.bf16.msra.mxu0 %v757_v39  ;;  %569 = vmatprep.mubr.bf16.mxu0 %v600_v50 }
  0x3d   :  { %530 = vmatmul.mubr.bf16.vlgmr.msra.gmra.mxu1 %v597_v37  ;;  %695 = vmatprep.subr.bf16.mxu0 %v758_v40 }
  0x40   :  { %696 = vmatpush3.bf16.msra.mxu0 %v759_v41 }
  0x41   :  { %697 = vmatprep.subr.bf16.mxu0 %v760_v42 }
  0x44   :  { %698 = vmatpush3.bf16.msra.mxu0 %v761_v43 }
  0x45   :  { %699 = vmatprep.subr.bf16.mxu0 %v762_v44 }
  0x48   :  { %700 = vmatpush3.bf16.msra.mxu0 %v763_v45 }
  0x49   :  { %701 = vmatprep.subr.bf16.mxu0 %v764_v46 }
  0x4c   :  { %702 = vmatpush3.bf16.msra.mxu0 %v765_v47 }
  0x4d   :  { %703 = vmatprep.subr.bf16.mxu0 %v766_v49 }
  0x50   :  { %704 = vmatpush3.bf16.msra.mxu0 %v767_v51 }
  0x51   :  { %705 = vmatprep.subr.bf16.mxu0 %v768_v52 }
  0x54   :  { %706 = vmatpush3.bf16.msra.mxu0 %v769_v53 }
  0x55   :  { %707 = vmatprep.subr.bf16.mxu0 %v770_v54 }
  0x58   :  { %708 = vmatpush3.bf16.msra.mxu0 %v771_v55 }
  0x5b   :  { %570 = vmatmul.mubr.bf16.vlgmr.msra.gmra.mxu0 %v599_v56 }
  0xfb   :  { %v665_v57 = vpop.f32.mrf.mxu0 }
  0xfd   :  { %v666_v58 = vpop.f32.mrf.mxu0  ;;  %v687_v59 = vpop.f32.mrf.mxu1 }
  0xfe   :  { %v667_v1 = vadd.f32 %v666_v58, %v665_v57 }
  0xff   :  { %v668_v60 = vpop.f32.mrf.mxu0  ;;  %v688_v61 = vpop.f32.mrf.mxu1 }
 0x100   :  { %v492_v3 = vadd.f32 %v667_v1, %v594_v2  ;;  %v689_v4 = vadd.f32 %v688_v61, %v687_v59 }
 0x101   :  { %v669_v62 = vpop.f32.mrf.mxu0  ;;  %v690_v63 = vpop.f32.mrf.mxu1 }
 0x102   :  { %v532_v7 = vadd.f32 %v689_v4, %v492_v3 }
 0x103   :  { %v691_v0 = vpop.f32.mrf.mxu1 }
 0x11b   :  { %v709_v5 = vpop.f32.mrf.mxu0 }
 0x11d   :  { %v710_v6 = vpop.f32.mrf.mxu0 }
 0x11e   :  { %v711_v8 = vadd.f32 %v710_v6, %v709_v5 }
 0x11f   :  { %v712_v9 = vpop.f32.mrf.mxu0 }
 0x120   :  { %v572_v10 = vadd.f32 %v711_v8, %v532_v7 }
 0x121   :  { %v713_v11 = vpop.f32.mrf.mxu0 }
 0x122   :  { %577 = vst [vmem:[#allocation7] sm:$0xff] %v572_v10 }
 0x123   :  { %825 = shalt.err (!%p822_p0)
}
 0x124   :  { %587 = dma.vmem_to_hbm [thread:$0]  %s585_s25, 128, %s880_s3, [#allocation4]  }
 0x125   :  { %838 = dma.done.wait [#allocation4], 128  }
 0x126   :  { %839 = vsyncadd [#allocation4], 4294967168 }
 0x127   :  { %591 = vsyncpa [#allocation3], 1 }
 0x128   :  { %592 = vsyncpa [#allocation6], 1 }
 0x129   :  { %593 = vsyncpa [#allocation4], 1 }

</bundles_post_ra>
